<compile_context>
chip_gen: v7x
topology: tpu7x:2x2x1
jax: 0.10.0
libtpu: 0.0.40
codegen_flags: <defaults>
</compile_context>

<pallas_src>
import functools
import math

import numpy as np

import jax
import jax.numpy as jnp
from jax import lax
from jax.experimental import pallas as pl
from jax.experimental.pallas import tpu as pltpu


# ------------------------------------------------------------------ kernel --
def _denoise_kernel(x_ref, *refs, R):
    """Runs the whole network on one (M = TB*R, 8*Cin) row slab.

    refs = [w0, b0, w1, b1, ..., w5, b5, out_ref]; each w is the K-stacked
    [Wmain; Wshift] block weight (bf16), each b a (1, N) f32 bias row.
    """
    out_ref = refs[-1]
    params = refs[:-1]

    a = x_ref[...]                                    # (M, 8*Cin) bf16
    M = a.shape[0]

    # Per-batch-element boundary masks on the flat row axis
    # (row m belongs to batch element m // R, sequence row m % R).  Hoisted.
    rows = lax.broadcasted_iota(jnp.int32, (M, 1), 0)
    first_row = (rows % R) == 0                       # encoder left edge rows
    last_row = (rows % R) == (R - 1)                  # decoder right edge rows

    def shift_down(t):                                # t[m] <- t[m-1], 0 at batch starts
        z = jnp.zeros((1, t.shape[1]), t.dtype)
        sh = jnp.concatenate([z, t[:-1, :]], axis=0)
        return jnp.where(first_row, jnp.zeros_like(sh), sh)

    def shift_up(t):                                  # t[m] <- t[m+1], 0 at batch ends
        z = jnp.zeros((1, t.shape[1]), t.dtype)
        sh = jnp.concatenate([t[1:, :], z], axis=0)
        return jnp.where(last_row, jnp.zeros_like(sh), sh)

    def layer(i, t, shift_fn, act):
        w = params[2 * i][...]                        # (2*C, N) bf16  [Wmain; Wshift]
        b = params[2 * i + 1][...]                    # (1, N) f32
        xx = jnp.concatenate([t, shift_fn(t)], axis=-1)      # (M, 2*C) bf16
        z = jnp.dot(xx, w, preferred_element_type=jnp.float32) + b
        if act == "relu":
            return jnp.maximum(z, 0.0).astype(jnp.bfloat16)  # bf16 intermediates
        return jax.nn.sigmoid(z)                      # f32 for the final store

    h = layer(0, a, shift_down, "relu")               # enc1 -> (M, 64)
    h = layer(1, h, shift_down, "relu")               # enc2 -> (M, 64)
    lat = layer(2, h, shift_down, "relu")             # enc3 -> (M, 16) latent
    # GradientReversalLayer is identity in forward; noise branch reads the same latent.
    d = layer(3, lat, shift_up, "relu")               # decS1 | decN1 (col-fused)  -> (M, 128)
    d = layer(4, d, shift_up, "relu")                 # decS2 + decN2 (block-diag) -> (M, 128)
    y = layer(5, d, shift_up, "sigmoid")              # decS3 + decN3 (block-diag) -> (M, 64)
    out_ref[...] = y                                  # [signal 8 | noise 56] lane-fused


# ------------------------------------------------- host-side weight packing --
# Packed activation representation: A[o, s*C + c] = act[c, r*o + s] (channels-
# last space-to-depth), so every stride-2 Conv1d / ConvTranspose1d layer is
#   B = act( concat([A, shift(A)]) @ [Wmain; Wshift] + bias_row ).

def _conv_pack(w, b, rin, rout):
    # Conv1d weight (Co, Ci, 3), stride 2, padding 1.  rin = 2 * rout.
    w = np.asarray(w, np.float32)
    Co, Ci, _ = w.shape
    V = [w[:, :, k].T for k in range(3)]                      # (Ci, Co) per tap
    wm = np.zeros((rin * Ci, rout * Co), np.float32)
    ws = np.zeros((rin * Ci, rout * Co), np.float32)
    for u in range(rout):
        wm[(2 * u) * Ci:(2 * u + 1) * Ci, u * Co:(u + 1) * Co] = V[1]      # x[2t]
        wm[(2 * u + 1) * Ci:(2 * u + 2) * Ci, u * Co:(u + 1) * Co] = V[2]  # x[2t+1]
        if u >= 1:
            wm[(2 * u - 1) * Ci:(2 * u) * Ci, u * Co:(u + 1) * Co] = V[0]  # x[2t-1]
    ws[(rin - 1) * Ci:rin * Ci, 0:Co] = V[0]                  # x[2t-1] from previous row
    if b is None:
        br = np.zeros((1, rout * Co), np.float32)
    else:
        br = np.tile(np.asarray(b, np.float32), rout)[None, :]
    return wm, ws, br


def _convT_pack(w, b, rin, rout):
    # ConvTranspose1d weight (Ci, Co, 3), stride 2, padding 1, output_padding 1.
    # rout = 2*rin.  y[2i] = z[i]W1 + b ; y[2i+1] = z[i]W2 + z[i+1]W0 + b.
    w = np.asarray(w, np.float32)
    Ci, Co, _ = w.shape
    U = [w[:, :, k] for k in range(3)]                        # (Ci, Co) per tap
    wm = np.zeros((rin * Ci, rout * Co), np.float32)
    ws = np.zeros((rin * Ci, rout * Co), np.float32)
    for u in range(rin):
        wm[u * Ci:(u + 1) * Ci, (2 * u) * Co:(2 * u + 1) * Co] = U[1]
        wm[u * Ci:(u + 1) * Ci, (2 * u + 1) * Co:(2 * u + 2) * Co] = U[2]
        if u < rin - 1:
            wm[(u + 1) * Ci:(u + 2) * Ci, (2 * u + 1) * Co:(2 * u + 2) * Co] = U[0]
    ws[0:Ci, (rout - 1) * Co:rout * Co] = U[0]                # z[i+1] from next row
    if b is None:
        br = np.zeros((1, rout * Co), np.float32)
    else:
        br = np.tile(np.asarray(b, np.float32), rout)[None, :]
    return wm, ws, br


def pack_params(params):
    def block_diag(a, b):
        out = np.zeros((a.shape[0] + b.shape[0], a.shape[1] + b.shape[1]), np.float32)
        out[:a.shape[0], :a.shape[1]] = a
        out[a.shape[0]:, a.shape[1]:] = b
        return out

    e1 = _conv_pack(params["enc1_w"], params["enc1_b"], 8, 4)
    e2 = _conv_pack(params["enc2_w"], params["enc2_b"], 4, 2)
    e3 = _conv_pack(params["enc3_w"], params["enc3_b"], 2, 1)

    # dec layer 1: signal + noise heads share the latent -> column concat (N=128).
    s1m, s1s, s1b = _convT_pack(params["decS1_w"], params["decS1_b"], 1, 2)
    n1m, n1s, n1b = _convT_pack(params["decN1_w"], None, 1, 2)
    d1 = (np.concatenate([s1m, n1m], 1), np.concatenate([s1s, n1s], 1),
          np.concatenate([s1b, n1b], 1))

    # dec layers 2/3: block-diagonal fusion of signal/noise branches.
    s2m, s2s, s2b = _convT_pack(params["decS2_w"], params["decS2_b"], 2, 4)
    n2m, n2s, n2b = _convT_pack(params["decN2_w"], None, 2, 4)
    d2 = (block_diag(s2m, n2m), block_diag(s2s, n2s), np.concatenate([s2b, n2b], 1))

    s3m, s3s, s3b = _convT_pack(params["decS3_w"], params["decS3_b"], 4, 8)
    n3m, n3s, n3b = _convT_pack(params["decN3_w"], None, 4, 8)
    d3 = (block_diag(s3m, n3m), block_diag(s3s, n3s), np.concatenate([s3b, n3b], 1))

    flat = []
    for wm, ws, br in (e1, e2, e3, d1, d2, d3):
        flat.append(jnp.asarray(np.concatenate([wm, ws], axis=0), jnp.bfloat16))  # K-stacked
        flat.append(jnp.asarray(br, jnp.float32))
    return tuple(flat)


# ------------------------------------------------------------------ forward --
def forward(packed_weights, x, *, target_rows=512):
    # x: (B, Cin, L) NCL, as in the PyTorch module.
    B, Cin, L = x.shape
    if L % 8 != 0:
        raise ValueError("sequence length must be a multiple of 8 (three stride-2 stages)")
    R = L // 8

    # Batch-block sizing: TB batch elements per grid step -> M = TB*R matmul rows.
    # Target >= ~512 rows; keep TB*R a multiple of 8 (sublane tiling); keep >= 2
    # grid steps when the batch allows so v7x's 2 TensorCores both get work.
    need = 8 // math.gcd(R, 8)
    tb = max(1, min(B, pl.cdiv(target_rows, R)))
    if pl.cdiv(B, tb) < 2 and B >= 2:
        tb = pl.cdiv(B, 2)
    tb = pl.cdiv(tb, need) * need
    nblk = pl.cdiv(B, tb)
    b_pad = nblk * tb
    M = tb * R

    # Space-to-depth pack: (B, Cin, L) -> (b_pad*R, 8*Cin) bf16 slab.
    xp = jnp.transpose(x, (0, 2, 1)).reshape(B, R, 8 * Cin)
    if b_pad != B:
        xp = jnp.concatenate([xp, jnp.zeros((b_pad - B, R, 8 * Cin), xp.dtype)], axis=0)
    x2 = xp.reshape(b_pad * R, 8 * Cin).astype(jnp.bfloat16)

    in_specs = [pl.BlockSpec((M, 8 * Cin), lambda i: (i, 0))]
    # Weights / bias rows: full-array blocks with constant index maps -> VMEM resident.
    in_specs += [pl.BlockSpec(a.shape, lambda i: (0, 0)) for a in packed_weights]
    out_specs = pl.BlockSpec((M, 64), lambda i: (i, 0))
    out_shape = jax.ShapeDtypeStruct((b_pad * R, 64), jnp.float32)

    y = pl.pallas_call(
        functools.partial(_denoise_kernel, R=R),
        out_shape=out_shape,
        grid_spec=pltpu.PrefetchScalarGridSpec(
            num_scalar_prefetch=0,
            grid=(nblk,),
            in_specs=in_specs,
            out_specs=out_specs),
        compiler_params=pltpu.CompilerParams(
            dimension_semantics=("parallel",),       # batch blocks shard across v7x's 2 TCs
            vmem_limit_bytes=32 * 1024 * 1024),      # ample; safe on v5e/v6e/v7x
    )(x2, *packed_weights)

    # Depth-to-space unpack of the single lane-fused output slab.
    y = y.reshape(b_pad, R, 64)[:B]                           # drop batch padding
    reconstructed = y[:, :, :8].reshape(B, 1, L)              # signal: Co=1 x 8 phases
    noise = jnp.transpose(y[:, :, 8:].reshape(B, L, 7), (0, 2, 1))  # noise: (B, 7, L)
    # NOTE: like torch's .squeeze(), this also drops the batch dim when B == 1.
    return jnp.squeeze(reconstructed), jnp.squeeze(noise)


# --------------------------------------------------------------- parameters --
def _uniform(key, shape, bound):
    return jax.random.uniform(key, shape, jnp.float32, -bound, bound)


def init_params(key, input_channels=1, latent_dim=16):
    specs = [
        ("enc1", "conv", input_channels, 16, True),
        ("enc2", "conv", 16, 32, True),
        ("enc3", "conv", 32, latent_dim, True),
        ("decS1", "convT", latent_dim, 32, True),
        ("decS2", "convT", 32, 16, True),
        ("decS3", "convT", 16, 1, True),
        ("decN1", "convT", latent_dim, 32, False),
        ("decN2", "convT", 32, 16, False),
        ("decN3", "convT", 16, 7, False),
    ]
    params = {}
    keys = jax.random.split(key, 2 * len(specs))
    for i, (name, kind, cin, cout, has_bias) in enumerate(specs):
        kw = 3
        fan_in = cin * kw if kind == "conv" else cout * kw
        bound = 1.0 / (fan_in ** 0.5)
        wshape = (cout, cin, kw) if kind == "conv" else (cin, cout, kw)
        params[name + "_w"] = _uniform(keys[2 * i], wshape, bound)
        if has_bias:
            params[name + "_b"] = _uniform(keys[2 * i + 1], (cout,), bound)
    return params


# --------------------------------------------------------------------- main --
if __name__ == "__main__":
    key = jax.random.PRNGKey(0)
    pkey, xkey = jax.random.split(key)
    params = init_params(pkey, input_channels=1, latent_dim=16)
    packed = pack_params(params)   # host-side one-time block-weight packing

    B, L = 6, 16                   # R = 2; TB=4 -> grid of 2 blocks (+2 padded batch rows)
    x = jax.random.normal(xkey, (B, 1, L), dtype=jnp.float32)

    rec, noi = jax.jit(forward)(packed, x)
    jax.block_until_ready((rec, noi))

    assert rec.shape == (B, L), rec.shape          # squeeze of (B, 1, L)
    assert noi.shape == (B, 7, L), noi.shape       # (B, 7, L), nothing squeezed
    assert bool(jnp.all(jnp.isfinite(rec))) and bool(jnp.all(jnp.isfinite(noi)))
    assert bool(jnp.all((rec >= 0) & (rec <= 1))) and bool(jnp.all((noi >= 0) & (noi <= 1)))
    print("KERNEL_OK")
</pallas_src>

<mosaic_0001>
module attributes {stable_mosaic.version = 11 : i64} {
  func.func @_denoise_kernel(%arg0: i32, %arg1: memref<8x8xbf16, #tpu.memory_space<vmem>>, %arg2: memref<16x64xbf16, #tpu.memory_space<vmem>>, %arg3: memref<1x64xf32, #tpu.memory_space<vmem>>, %arg4: memref<128x64xbf16, #tpu.memory_space<vmem>>, %arg5: memref<1x64xf32, #tpu.memory_space<vmem>>, %arg6: memref<128x16xbf16, #tpu.memory_space<vmem>>, %arg7: memref<1x16xf32, #tpu.memory_space<vmem>>, %arg8: memref<32x128xbf16, #tpu.memory_space<vmem>>, %arg9: memref<1x128xf32, #tpu.memory_space<vmem>>, %arg10: memref<256x128xbf16, #tpu.memory_space<vmem>>, %arg11: memref<1x128xf32, #tpu.memory_space<vmem>>, %arg12: memref<256x64xbf16, #tpu.memory_space<vmem>>, %arg13: memref<1x64xf32, #tpu.memory_space<vmem>>, %arg14: memref<8x64xf32, #tpu.memory_space<vmem>>) attributes {dimension_semantics = [#tpu.dimension_semantics<parallel>], iteration_bounds = array<i64: 2>, scalar_prefetch = 0 : i64, scratch_operands = 0 : i64, tpu.core_type = #tpu.core_type<tc>, window_params = [{transform_indices = @transform_0, window_bounds = array<i64: 8, 8>}, {pipeline_mode = #tpu.pipeline_mode<synchronous>, transform_indices = @transform_1, window_bounds = array<i64: 16, 64>}, {pipeline_mode = #tpu.pipeline_mode<synchronous>, transform_indices = @transform_2, window_bounds = array<i64: 1, 64>}, {pipeline_mode = #tpu.pipeline_mode<synchronous>, transform_indices = @transform_3, window_bounds = array<i64: 128, 64>}, {pipeline_mode = #tpu.pipeline_mode<synchronous>, transform_indices = @transform_4, window_bounds = array<i64: 1, 64>}, {pipeline_mode = #tpu.pipeline_mode<synchronous>, transform_indices = @transform_5, window_bounds = array<i64: 128, 16>}, {pipeline_mode = #tpu.pipeline_mode<synchronous>, transform_indices = @transform_6, window_bounds = array<i64: 1, 16>}, {pipeline_mode = #tpu.pipeline_mode<synchronous>, transform_indices = @transform_7, window_bounds = array<i64: 32, 128>}, {pipeline_mode = #tpu.pipeline_mode<synchronous>, transform_indices = @transform_8, window_bounds = array<i64: 1, 128>}, {pipeline_mode = #tpu.pipeline_mode<synchronous>, transform_indices = @transform_9, window_bounds = array<i64: 256, 128>}, {pipeline_mode = #tpu.pipeline_mode<synchronous>, transform_indices = @transform_10, window_bounds = array<i64: 1, 128>}, {pipeline_mode = #tpu.pipeline_mode<synchronous>, transform_indices = @transform_11, window_bounds = array<i64: 256, 64>}, {pipeline_mode = #tpu.pipeline_mode<synchronous>, transform_indices = @transform_12, window_bounds = array<i64: 1, 64>}, {transform_indices = @transform_13, window_bounds = array<i64: 8, 64>}]} {
    %c0 = arith.constant 0 : index
    %c0_0 = arith.constant 0 : index
    %0 = vector.load %arg1[%c0, %c0_0] : memref<8x8xbf16, #tpu.memory_space<vmem>>, vector<8x8xbf16>
    %1 = tpu.iota {dimensions = array<i32: 0>} : vector<8x1xi32>
    %c2_i32 = arith.constant 2 : i32
    %c0_i32 = arith.constant 0 : i32
    %2 = arith.cmpi eq, %c2_i32, %c0_i32 : i32
    %c1_i32 = arith.constant 1 : i32
    %3 = arith.select %2, %c1_i32, %c2_i32 : i32
    %4 = vector.broadcast %3 : i32 to vector<8x1xi32>
    %5 = arith.remsi %1, %4 : vector<8x1xi32>
    %c0_i32_1 = arith.constant 0 : i32
    %6 = vector.broadcast %c0_i32_1 : i32 to vector<8x1xi32>
    %7 = arith.cmpi ne, %5, %6 : vector<8x1xi32>
    %c0_i32_2 = arith.constant 0 : i32
    %8 = vector.broadcast %c0_i32_2 : i32 to vector<8x1xi32>
    %9 = arith.cmpi slt, %5, %8 : vector<8x1xi32>
    %c0_i32_3 = arith.constant 0 : i32
    %10 = arith.cmpi slt, %3, %c0_i32_3 : i32
    %11 = vector.broadcast %10 : i1 to vector<8x1xi1>
    %12 = vector.broadcast %11 : vector<8x1xi1> to vector<8x1xi1>
    %13 = arith.xori %9, %12 : vector<8x1xi1>
    %14 = arith.andi %13, %7 : vector<8x1xi1>
    %15 = vector.broadcast %3 : i32 to vector<8x1xi32>
    %16 = arith.addi %5, %15 : vector<8x1xi32>
    %17 = arith.select %14, %16, %5 : vector<8x1xi1>, vector<8x1xi32>
    %c0_i32_4 = arith.constant 0 : i32
    %18 = vector.broadcast %c0_i32_4 : i32 to vector<8x1xi32>
    %19 = arith.cmpi eq, %17, %18 : vector<8x1xi32>
    %c2_i32_5 = arith.constant 2 : i32
    %c0_i32_6 = arith.constant 0 : i32
    %20 = arith.cmpi eq, %c2_i32_5, %c0_i32_6 : i32
    %c1_i32_7 = arith.constant 1 : i32
    %21 = arith.select %20, %c1_i32_7, %c2_i32_5 : i32
    %22 = vector.broadcast %21 : i32 to vector<8x1xi32>
    %23 = arith.remsi %1, %22 : vector<8x1xi32>
    %c0_i32_8 = arith.constant 0 : i32
    %24 = vector.broadcast %c0_i32_8 : i32 to vector<8x1xi32>
    %25 = arith.cmpi ne, %23, %24 : vector<8x1xi32>
    %c0_i32_9 = arith.constant 0 : i32
    %26 = vector.broadcast %c0_i32_9 : i32 to vector<8x1xi32>
    %27 = arith.cmpi slt, %23, %26 : vector<8x1xi32>
    %c0_i32_10 = arith.constant 0 : i32
    %28 = arith.cmpi slt, %21, %c0_i32_10 : i32
    %29 = vector.broadcast %28 : i1 to vector<8x1xi1>
    %30 = vector.broadcast %29 : vector<8x1xi1> to vector<8x1xi1>
    %31 = arith.xori %27, %30 : vector<8x1xi1>
    %32 = arith.andi %31, %25 : vector<8x1xi1>
    %33 = vector.broadcast %21 : i32 to vector<8x1xi32>
    %34 = arith.addi %23, %33 : vector<8x1xi32>
    %35 = arith.select %32, %34, %23 : vector<8x1xi1>, vector<8x1xi32>
    %c1_i32_11 = arith.constant 1 : i32
    %36 = vector.broadcast %c1_i32_11 : i32 to vector<8x1xi32>
    %37 = arith.cmpi eq, %35, %36 : vector<8x1xi32>
    %c0_12 = arith.constant 0 : index
    %c0_13 = arith.constant 0 : index
    %38 = vector.load %arg2[%c0_12, %c0_13] : memref<16x64xbf16, #tpu.memory_space<vmem>>, vector<16x64xbf16>
    %c0_14 = arith.constant 0 : index
    %c0_15 = arith.constant 0 : index
    %39 = vector.load %arg3[%c0_14, %c0_15] : memref<1x64xf32, #tpu.memory_space<vmem>>, vector<1x64xf32>
    %cst = arith.constant 0.000000e+00 : bf16
    %40 = vector.broadcast %cst : bf16 to vector<1x8xbf16>
    %41 = vector.extract_strided_slice %0 {offsets = [0, 0], sizes = [7, 8], strides = [1, 1]} : vector<8x8xbf16> to vector<7x8xbf16>
    %42 = tpu.concatenate %40, %41 in 0 : vector<1x8xbf16>, vector<7x8xbf16> -> vector<8x8xbf16>
    %cst_16 = arith.constant 0.000000e+00 : bf16
    %43 = vector.broadcast %cst_16 : bf16 to vector<8x8xbf16>
    %44 = vector.shape_cast %19 : vector<8x1xi1> to vector<8x1xi1>
    %45 = vector.broadcast %44 : vector<8x1xi1> to vector<8x8xi1>
    %46 = arith.select %45, %43, %42 : vector<8x8xi1>, vector<8x8xbf16>
    %47 = tpu.concatenate %0, %46 in 1 : vector<8x8xbf16>, vector<8x8xbf16> -> vector<8x16xbf16>
    %cst_17 = arith.constant dense<0.000000e+00> : vector<8x64xf32>
    %48 = tpu.matmul %47, %38, %cst_17 {dimension_numbers = #tpu.dot_dimension_numbers<[1], [0], [0], [1], [0, 0, 1, 1], [], []>} : vector<8x16xbf16>, vector<16x64xbf16>, vector<8x64xf32> -> vector<8x64xf32>
    %49 = vector.broadcast %39 : vector<1x64xf32> to vector<8x64xf32>
    %50 = arith.addf %48, %49 : vector<8x64xf32>
    %cst_18 = arith.constant 0.000000e+00 : f32
    %51 = vector.broadcast %cst_18 : f32 to vector<8x64xf32>
    %52 = arith.maximumf %50, %51 : vector<8x64xf32>
    %53 = arith.truncf %52 : vector<8x64xf32> to vector<8x64xbf16>
    %c0_19 = arith.constant 0 : index
    %c0_20 = arith.constant 0 : index
    %54 = vector.load %arg4[%c0_19, %c0_20] : memref<128x64xbf16, #tpu.memory_space<vmem>>, vector<128x64xbf16>
    %c0_21 = arith.constant 0 : index
    %c0_22 = arith.constant 0 : index
    %55 = vector.load %arg5[%c0_21, %c0_22] : memref<1x64xf32, #tpu.memory_space<vmem>>, vector<1x64xf32>
    %cst_23 = arith.constant 0.000000e+00 : bf16
    %56 = vector.broadcast %cst_23 : bf16 to vector<1x64xbf16>
    %57 = vector.extract_strided_slice %53 {offsets = [0, 0], sizes = [7, 64], strides = [1, 1]} : vector<8x64xbf16> to vector<7x64xbf16>
    %58 = tpu.concatenate %56, %57 in 0 : vector<1x64xbf16>, vector<7x64xbf16> -> vector<8x64xbf16>
    %cst_24 = arith.constant 0.000000e+00 : bf16
    %59 = vector.broadcast %cst_24 : bf16 to vector<8x64xbf16>
    %60 = vector.shape_cast %19 : vector<8x1xi1> to vector<8x1xi1>
    %61 = vector.broadcast %60 : vector<8x1xi1> to vector<8x64xi1>
    %62 = arith.select %61, %59, %58 : vector<8x64xi1>, vector<8x64xbf16>
    %63 = tpu.concatenate %53, %62 in 1 : vector<8x64xbf16>, vector<8x64xbf16> -> vector<8x128xbf16>
    %cst_25 = arith.constant dense<0.000000e+00> : vector<8x64xf32>
    %64 = tpu.matmul %63, %54, %cst_25 {dimension_numbers = #tpu.dot_dimension_numbers<[1], [0], [0], [1], [0, 0, 1, 1], [], []>} : vector<8x128xbf16>, vector<128x64xbf16>, vector<8x64xf32> -> vector<8x64xf32>
    %65 = vector.broadcast %55 : vector<1x64xf32> to vector<8x64xf32>
    %66 = arith.addf %64, %65 : vector<8x64xf32>
    %cst_26 = arith.constant 0.000000e+00 : f32
    %67 = vector.broadcast %cst_26 : f32 to vector<8x64xf32>
    %68 = arith.maximumf %66, %67 : vector<8x64xf32>
    %69 = arith.truncf %68 : vector<8x64xf32> to vector<8x64xbf16>
    %c0_27 = arith.constant 0 : index
    %c0_28 = arith.constant 0 : index
    %70 = vector.load %arg6[%c0_27, %c0_28] : memref<128x16xbf16, #tpu.memory_space<vmem>>, vector<128x16xbf16>
    %c0_29 = arith.constant 0 : index
    %c0_30 = arith.constant 0 : index
    %71 = vector.load %arg7[%c0_29, %c0_30] : memref<1x16xf32, #tpu.memory_space<vmem>>, vector<1x16xf32>
    %cst_31 = arith.constant 0.000000e+00 : bf16
    %72 = vector.broadcast %cst_31 : bf16 to vector<1x64xbf16>
    %73 = vector.extract_strided_slice %69 {offsets = [0, 0], sizes = [7, 64], strides = [1, 1]} : vector<8x64xbf16> to vector<7x64xbf16>
    %74 = tpu.concatenate %72, %73 in 0 : vector<1x64xbf16>, vector<7x64xbf16> -> vector<8x64xbf16>
    %cst_32 = arith.constant 0.000000e+00 : bf16
    %75 = vector.broadcast %cst_32 : bf16 to vector<8x64xbf16>
    %76 = vector.shape_cast %19 : vector<8x1xi1> to vector<8x1xi1>
    %77 = vector.broadcast %76 : vector<8x1xi1> to vector<8x64xi1>
    %78 = arith.select %77, %75, %74 : vector<8x64xi1>, vector<8x64xbf16>
    %79 = tpu.concatenate %69, %78 in 1 : vector<8x64xbf16>, vector<8x64xbf16> -> vector<8x128xbf16>
    %cst_33 = arith.constant dense<0.000000e+00> : vector<8x16xf32>
    %80 = tpu.matmul %79, %70, %cst_33 {dimension_numbers = #tpu.dot_dimension_numbers<[1], [0], [0], [1], [0, 0, 1, 1], [], []>} : vector<8x128xbf16>, vector<128x16xbf16>, vector<8x16xf32> -> vector<8x16xf32>
    %81 = vector.broadcast %71 : vector<1x16xf32> to vector<8x16xf32>
    %82 = arith.addf %80, %81 : vector<8x16xf32>
    %cst_34 = arith.constant 0.000000e+00 : f32
    %83 = vector.broadcast %cst_34 : f32 to vector<8x16xf32>
    %84 = arith.maximumf %82, %83 : vector<8x16xf32>
    %85 = arith.truncf %84 : vector<8x16xf32> to vector<8x16xbf16>
    %c0_35 = arith.constant 0 : index
    %c0_36 = arith.constant 0 : index
    %86 = vector.load %arg8[%c0_35, %c0_36] : memref<32x128xbf16, #tpu.memory_space<vmem>>, vector<32x128xbf16>
    %c0_37 = arith.constant 0 : index
    %c0_38 = arith.constant 0 : index
    %87 = vector.load %arg9[%c0_37, %c0_38] : memref<1x128xf32, #tpu.memory_space<vmem>>, vector<1x128xf32>
    %cst_39 = arith.constant 0.000000e+00 : bf16
    %88 = vector.broadcast %cst_39 : bf16 to vector<1x16xbf16>
    %89 = vector.extract_strided_slice %85 {offsets = [1, 0], sizes = [7, 16], strides = [1, 1]} : vector<8x16xbf16> to vector<7x16xbf16>
    %90 = tpu.concatenate %89, %88 in 0 : vector<7x16xbf16>, vector<1x16xbf16> -> vector<8x16xbf16>
    %cst_40 = arith.constant 0.000000e+00 : bf16
    %91 = vector.broadcast %cst_40 : bf16 to vector<8x16xbf16>
    %92 = vector.shape_cast %37 : vector<8x1xi1> to vector<8x1xi1>
    %93 = vector.broadcast %92 : vector<8x1xi1> to vector<8x16xi1>
    %94 = arith.select %93, %91, %90 : vector<8x16xi1>, vector<8x16xbf16>
    %95 = tpu.concatenate %85, %94 in 1 : vector<8x16xbf16>, vector<8x16xbf16> -> vector<8x32xbf16>
    %cst_41 = arith.constant dense<0.000000e+00> : vector<8x128xf32>
    %96 = tpu.matmul %95, %86, %cst_41 {dimension_numbers = #tpu.dot_dimension_numbers<[1], [0], [0], [1], [0, 0, 1, 1], [], []>} : vector<8x32xbf16>, vector<32x128xbf16>, vector<8x128xf32> -> vector<8x128xf32>
    %97 = vector.broadcast %87 : vector<1x128xf32> to vector<8x128xf32>
    %98 = arith.addf %96, %97 : vector<8x128xf32>
    %cst_42 = arith.constant 0.000000e+00 : f32
    %99 = vector.broadcast %cst_42 : f32 to vector<8x128xf32>
    %100 = arith.maximumf %98, %99 : vector<8x128xf32>
    %101 = arith.truncf %100 : vector<8x128xf32> to vector<8x128xbf16>
    %c0_43 = arith.constant 0 : index
    %c0_44 = arith.constant 0 : index
    %102 = vector.load %arg10[%c0_43, %c0_44] : memref<256x128xbf16, #tpu.memory_space<vmem>>, vector<256x128xbf16>
    %c0_45 = arith.constant 0 : index
    %c0_46 = arith.constant 0 : index
    %103 = vector.load %arg11[%c0_45, %c0_46] : memref<1x128xf32, #tpu.memory_space<vmem>>, vector<1x128xf32>
    %cst_47 = arith.constant 0.000000e+00 : bf16
    %104 = vector.broadcast %cst_47 : bf16 to vector<1x128xbf16>
    %105 = vector.extract_strided_slice %101 {offsets = [1, 0], sizes = [7, 128], strides = [1, 1]} : vector<8x128xbf16> to vector<7x128xbf16>
    %106 = tpu.concatenate %105, %104 in 0 : vector<7x128xbf16>, vector<1x128xbf16> -> vector<8x128xbf16>
    %cst_48 = arith.constant 0.000000e+00 : bf16
    %107 = vector.broadcast %cst_48 : bf16 to vector<8x128xbf16>
    %108 = vector.shape_cast %37 : vector<8x1xi1> to vector<8x1xi1>
    %109 = vector.broadcast %108 : vector<8x1xi1> to vector<8x128xi1>
    %110 = arith.select %109, %107, %106 : vector<8x128xi1>, vector<8x128xbf16>
    %111 = tpu.concatenate %101, %110 in 1 : vector<8x128xbf16>, vector<8x128xbf16> -> vector<8x256xbf16>
    %cst_49 = arith.constant dense<0.000000e+00> : vector<8x128xf32>
    %112 = tpu.matmul %111, %102, %cst_49 {dimension_numbers = #tpu.dot_dimension_numbers<[1], [0], [0], [1], [0, 0, 1, 1], [], []>} : vector<8x256xbf16>, vector<256x128xbf16>, vector<8x128xf32> -> vector<8x128xf32>
    %113 = vector.broadcast %103 : vector<1x128xf32> to vector<8x128xf32>
    %114 = arith.addf %112, %113 : vector<8x128xf32>
    %cst_50 = arith.constant 0.000000e+00 : f32
    %115 = vector.broadcast %cst_50 : f32 to vector<8x128xf32>
    %116 = arith.maximumf %114, %115 : vector<8x128xf32>
    %117 = arith.truncf %116 : vector<8x128xf32> to vector<8x128xbf16>
    %c0_51 = arith.constant 0 : index
    %c0_52 = arith.constant 0 : index
    %118 = vector.load %arg12[%c0_51, %c0_52] : memref<256x64xbf16, #tpu.memory_space<vmem>>, vector<256x64xbf16>
    %c0_53 = arith.constant 0 : index
    %c0_54 = arith.constant 0 : index
    %119 = vector.load %arg13[%c0_53, %c0_54] : memref<1x64xf32, #tpu.memory_space<vmem>>, vector<1x64xf32>
    %cst_55 = arith.constant 0.000000e+00 : bf16
    %120 = vector.broadcast %cst_55 : bf16 to vector<1x128xbf16>
    %121 = vector.extract_strided_slice %117 {offsets = [1, 0], sizes = [7, 128], strides = [1, 1]} : vector<8x128xbf16> to vector<7x128xbf16>
    %122 = tpu.concatenate %121, %120 in 0 : vector<7x128xbf16>, vector<1x128xbf16> -> vector<8x128xbf16>
    %cst_56 = arith.constant 0.000000e+00 : bf16
    %123 = vector.broadcast %cst_56 : bf16 to vector<8x128xbf16>
    %124 = vector.shape_cast %37 : vector<8x1xi1> to vector<8x1xi1>
    %125 = vector.broadcast %124 : vector<8x1xi1> to vector<8x128xi1>
    %126 = arith.select %125, %123, %122 : vector<8x128xi1>, vector<8x128xbf16>
    %127 = tpu.concatenate %117, %126 in 1 : vector<8x128xbf16>, vector<8x128xbf16> -> vector<8x256xbf16>
    %cst_57 = arith.constant dense<0.000000e+00> : vector<8x64xf32>
    %128 = tpu.matmul %127, %118, %cst_57 {dimension_numbers = #tpu.dot_dimension_numbers<[1], [0], [0], [1], [0, 0, 1, 1], [], []>} : vector<8x256xbf16>, vector<256x64xbf16>, vector<8x64xf32> -> vector<8x64xf32>
    %129 = vector.broadcast %119 : vector<1x64xf32> to vector<8x64xf32>
    %130 = arith.addf %128, %129 : vector<8x64xf32>
    %131 = arith.negf %130 : vector<8x64xf32>
    %132 = math.exp %131 : vector<8x64xf32>
    %cst_58 = arith.constant 1.000000e+00 : f32
    %133 = vector.broadcast %cst_58 : f32 to vector<8x64xf32>
    %134 = arith.addf %133, %132 : vector<8x64xf32>
    %135 = arith.divf %133, %134 : vector<8x64xf32>
    %c0_59 = arith.constant 0 : index
    %c0_60 = arith.constant 0 : index
    %136 = vector.load %arg14[%c0_59, %c0_60] : memref<8x64xf32, #tpu.memory_space<vmem>>, vector<8x64xf32>
    tpu.vector_store %arg14[%c0_59, %c0_60], %135 {strides = array<i32>} : memref<8x64xf32, #tpu.memory_space<vmem>>, vector<8x64xf32>,
    return
  }
  func.func @transform_0(%arg0: i32) -> (i32, i32) {
    %c0_i32 = arith.constant 0 : i32
    %c0_i32_0 = arith.constant 0 : i32
    return %arg0, %c0_i32 : i32, i32
  }
  func.func @transform_1(%arg0: i32) -> (i32, i32) {
    %c0_i32 = arith.constant 0 : i32
    %c0_i32_0 = arith.constant 0 : i32
    %c0_i32_1 = arith.constant 0 : i32
    return %c0_i32, %c0_i32_0 : i32, i32
  }
  func.func @transform_2(%arg0: i32) -> (i32, i32) {
    %c0_i32 = arith.constant 0 : i32
    %c0_i32_0 = arith.constant 0 : i32
    %c0_i32_1 = arith.constant 0 : i32
    return %c0_i32, %c0_i32_0 : i32, i32
  }
  func.func @transform_3(%arg0: i32) -> (i32, i32) {
    %c0_i32 = arith.constant 0 : i32
    %c0_i32_0 = arith.constant 0 : i32
    %c0_i32_1 = arith.constant 0 : i32
    return %c0_i32, %c0_i32_0 : i32, i32
  }
  func.func @transform_4(%arg0: i32) -> (i32, i32) {
    %c0_i32 = arith.constant 0 : i32
    %c0_i32_0 = arith.constant 0 : i32
    %c0_i32_1 = arith.constant 0 : i32
    return %c0_i32, %c0_i32_0 : i32, i32
  }
  func.func @transform_5(%arg0: i32) -> (i32, i32) {
    %c0_i32 = arith.constant 0 : i32
    %c0_i32_0 = arith.constant 0 : i32
    %c0_i32_1 = arith.constant 0 : i32
    return %c0_i32, %c0_i32_0 : i32, i32
  }
  func.func @transform_6(%arg0: i32) -> (i32, i32) {
    %c0_i32 = arith.constant 0 : i32
    %c0_i32_0 = arith.constant 0 : i32
    %c0_i32_1 = arith.constant 0 : i32
    return %c0_i32, %c0_i32_0 : i32, i32
  }
  func.func @transform_7(%arg0: i32) -> (i32, i32) {
    %c0_i32 = arith.constant 0 : i32
    %c0_i32_0 = arith.constant 0 : i32
    %c0_i32_1 = arith.constant 0 : i32
    return %c0_i32, %c0_i32_0 : i32, i32
  }
  func.func @transform_8(%arg0: i32) -> (i32, i32) {
    %c0_i32 = arith.constant 0 : i32
    %c0_i32_0 = arith.constant 0 : i32
    %c0_i32_1 = arith.constant 0 : i32
    return %c0_i32, %c0_i32_0 : i32, i32
  }
  func.func @transform_9(%arg0: i32) -> (i32, i32) {
    %c0_i32 = arith.constant 0 : i32
    %c0_i32_0 = arith.constant 0 : i32
    %c0_i32_1 = arith.constant 0 : i32
    return %c0_i32, %c0_i32_0 : i32, i32
  }
  func.func @transform_10(%arg0: i32) -> (i32, i32) {
    %c0_i32 = arith.constant 0 : i32
    %c0_i32_0 = arith.constant 0 : i32
    %c0_i32_1 = arith.constant 0 : i32
    return %c0_i32, %c0_i32_0 : i32, i32
  }
  func.func @transform_11(%arg0: i32) -> (i32, i32) {
    %c0_i32 = arith.constant 0 : i32
    %c0_i32_0 = arith.constant 0 : i32
    %c0_i32_1 = arith.constant 0 : i32
    return %c0_i32, %c0_i32_0 : i32, i32
  }
  func.func @transform_12(%arg0: i32) -> (i32, i32) {
    %c0_i32 = arith.constant 0 : i32
    %c0_i32_0 = arith.constant 0 : i32
    %c0_i32_1 = arith.constant 0 : i32
    return %c0_i32, %c0_i32_0 : i32, i32
  }
  func.func @transform_13(%arg0: i32) -> (i32, i32) {
    %c0_i32 = arith.constant 0 : i32
    %c0_i32_0 = arith.constant 0 : i32
    return %arg0, %c0_i32 : i32, i32
  }
}

</mosaic_0001>

<bundles_post_ra>
// kernel: forward.1
= control target key start
LH: loop header
LB: loop body
LE: loop exit
PB: predicated region body
PF: predicated region fallthrough
CT: control target
= control target key end

     0   :  { %s1663_s25 = smov 0   ;;  %s1936_s0 = inlined_call_operand.vmem [shape: bf16[16,8], index: 0, kind: input, shape index: {}]   ;;  %s1937_s1 = inlined_call_operand.vmem [shape: bf16[16,64], index: 1, kind: input, shape index: {}]   ;;  %s1938_s2 = inlined_call_operand.vmem [shape: f32[1,64], index: 2, kind: input, shape index: {}]   ;;  %s1939_s3 = inlined_call_operand.vmem [shape: bf16[128,64], index: 3, kind: input, shape index: {}]   ;;  %s1940_s4 = inlined_call_operand.vmem [shape: f32[1,64], index: 4, kind: input, shape index: {}]   ;;  %s1941_s5 = inlined_call_operand.vmem [shape: bf16[128,16], index: 5, kind: input, shape index: {}]   ;;  %s1942_s6 = inlined_call_operand.vmem [shape: f32[1,16], index: 6, kind: input, shape index: {}]   ;;  %s1943_s7 = inlined_call_operand.vmem [shape: bf16[32,128], index: 7, kind: input, shape index: {}]   ;;  %s1944_s8 = inlined_call_operand.vmem [shape: f32[1,128], index: 8, kind: input, shape index: {}]   ;;  %s1945_s9 = inlined_call_operand.vmem [shape: bf16[256,128], index: 9, kind: input, shape index: {}]   ;;  %s1946_s10 = inlined_call_operand.vmem [shape: f32[1,128], index: 10, kind: input, shape index: {}]   ;;  %s1947_s11 = inlined_call_operand.vmem [shape: bf16[256,64], index: 11, kind: input, shape index: {}]   ;;  %s1948_s12 = inlined_call_operand.vmem [shape: f32[1,64], index: 12, kind: input, shape index: {}]   ;;  %s1949_s13 = inlined_call_operand.vmem [shape: f32[16,64], index: 13, kind: output, shape index: {}]  }
   0x1 LB: > { %s1320_s26 = sadd.s32 4294967295, %s1586_s25   ;;  %p1324_p0 = scmp.ge.s32.totalorder %s1586_s25, 1  ;;  %s1586_s25 = sphi %s1663_s25, %s23_s25  }
   0x2   : > { %p386_p1 = scmp.lt.s32.totalorder %s1586_s25, 3 }
   0x4   : > { %p387_p2 = pnand %p1324_p0, %p386_p1 }
   0x5   : > { %p428_p3 = scmp.lt.s32.totalorder (!%p387_p2), %s1320_s26, 1  ;;  %v438_v0 = vlaneseq (!%p387_p2)  ;;  %v1588_v1 = vmov (!%p387_p2), 0.0   ;;  %v1525_v3 = vld [vmem:[%s1937_s1] sm:$0xff] (!%p387_p2)   ;;  %vm1589_vm0 = vmmov (!%p387_p2), 0   ;;  %vm468_vm1 = vcmask (!%p387_p2), 1040384   ;;  %s1590_s16 = smov (!%p387_p2), 8  }
   0x6   : > { %390 = sbr.rel (%p387_p2) target bundleno = 1870 (0x74e), region = 72  ;;  %1457 = vmatprep.subr.bf16.mxu0 (!%p387_p2), %v1588_v1  ;;  %1463 = vmatprep.subr.bf16.mxu1 (!%p387_p2), %v1588_v1  ;;  %vm469_vm2 = vsmask.f32 (!%p387_p2), 256  ;;  %vm479_vm6 = vcmask (!%p387_p2), 64512   ;;  %vm495_vm7 = vcmask (!%p387_p2), 130048   ;;  %v1526_v17 = vld [vmem:[%s1939_s3] sm:$0xff] (!%p387_p2)  }
   0x7   : > { %v1675_v2 = vshrl.u32 (!%p387_p2), %v438_v0, 7  ;;  %1458 = vmatpush3.bf16.msra.mxu0 (!%p387_p2), %v1525_v3  ;;  %1459 = vmatprep.mubr.msk.bf16.mxu0 (!%p387_p2), %vm1589_vm0, %v1588_v1  ;;  %vm1692_vm4 = vmand (!%p387_p2), %vm468_vm1, %vm469_vm2  ;;  %v1527_v18 = vld [vmem:[%s1939_s3 + $0x8] sm:$0xff] (!%p387_p2)   ;;  %v1528_v19 = vld [vmem:[%s1939_s3 + $0x10] sm:$0xff] (!%p387_p2)   ;;  %s1591_s20 = smov (!%p387_p2), 64   ;;  %vm570_vm8 = vcmask (!%p387_p2), 523264   ;;  %vm812_vm9 = vcmask (!%p387_p2), 1043456  }
   0x8   : > { %1479 = vmatprep.mubr.msk.bf16.mxu1 (!%p387_p2), %vm1589_vm0, %v1588_v1  ;;  %1483 = vmatprep.subr.bf16.mxu0 (!%p387_p2), %v1588_v1  ;;  %v1529_v20 = vld [vmem:[%s1939_s3 + $0x18] sm:$0xff] (!%p387_p2)   ;;  %v1530_v21 = vld [vmem:[%s1939_s3 + $0x20] sm:$0xff] (!%p387_p2)   ;;  %v1531_v22 = vld [vmem:[%s1939_s3 + $0x28] sm:$0xff] (!%p387_p2)   ;;  %vm813_vm10 = vsmask.f32 (!%p387_p2), 3328  ;;  %vm843_vm14 = vcmask (!%p387_p2), 261120  }
   0x9   : > { %v444_v4 = vand.u32 (!%p387_p2), 1, %v1675_v2  ;;  %1464 = vmatpush3.bf16.msra.mxu1 (!%p387_p2), %v1526_v17  ;;  %v1532_v23 = vld [vmem:[%s1939_s3 + $0x30] sm:$0xff] (!%p387_p2)   ;;  %v1533_v24 = vld [vmem:[%s1939_s3 + $0x38] sm:$0xff] (!%p387_p2)   ;;  %v1328_v25 = vld [vmem:[%s1938_s2] ss:$0 sm:$0xff] (!%p387_p2) }
   0xa   : > { %1465 = vmatprep.subr.bf16.mxu1 (!%p387_p2), %v1588_v1  ;;  %v1534_v41 = vld [vmem:[%s1941_s5] sm:$0xff] (!%p387_p2)   ;;  %v1535_v42 = vld [vmem:[%s1941_s5 + $0x8] sm:$0xff] (!%p387_p2)   ;;  %v1536_v43 = vld [vmem:[%s1941_s5 + $0x10] sm:$0xff] (!%p387_p2)  }
   0xb   : > { %vm452_vm3 = vcmp.eq.s32.totalorder (!%p387_p2), %v444_v4, 0  ;;  %v1537_v44 = vld [vmem:[%s1941_s5 + $0x18] sm:$0xff] (!%p387_p2)   ;;  %v1538_v45 = vld [vmem:[%s1941_s5 + $0x20] sm:$0xff] (!%p387_p2)   ;;  %v1539_v46 = vld [vmem:[%s1941_s5 + $0x28] sm:$0xff] (!%p387_p2)   ;;  %vm453_vm11 = vcmp.eq.s32.totalorder (!%p387_p2), %v444_v4, 1 }
   0xc   : > { %vm1696_vm5 = vmpackc.low (!%p387_p2), %vm452_vm3, %vm452_vm3  ;;  %v1540_v47 = vld [vmem:[%s1941_s5 + $0x30] sm:$0xff] (!%p387_p2)   ;;  %v1541_v48 = vld [vmem:[%s1941_s5 + $0x38] sm:$0xff] (!%p387_p2)  }
   0xd   : > { %s1959_s26 = smov (!%p428_p3, %s1320_s26), 1  ;;  %1466 = vmatpush3.bf16.msra.mxu1 %v1527_v18  ;;  %v1331_v49 = vld [vmem:[%s1940_s4] ss:$0 sm:$0xff]  ;;  %v1548_v18 = vld [vmem:[%s1945_s9 + $0x50] sm:$0xff]   ;;  %vm1817_vm12 = vmand %vm812_vm9, %vm813_vm10 }
   0xe   : > { %s1325_s29 = sshll.u32 %s1959_s26, 2  ;;  %1467 = vmatprep.subr.bf16.mxu1 %v1588_v1  ;;  %v1542_v3 = vld [vmem:[%s1943_s7] sm:$0xff]   ;;  %vm1824_vm13 = vmpackc.low %vm453_vm11, %vm453_vm11  ;;  %v1550_v2 = vld [vmem:[%s1945_s9 + $0x58] sm:$0xff]  }
   0xf   : > { %s431_s15 = scalar_lea.vmem %s1936_s0, %s1325_s29  ;;  %s1326_s29 = sshll.u32 %s1959_s26, 3 }
  0x10   : > { %v437_v5 = vld [vmem:[%s431_s15] sm:$0xf]  ;;  %s435_s15 = scalar_lea.vmem %s1949_s13, %s1326_s29 }
  0x11   : > { %v1327_v6 = vcombine.low %v437_v5, %v437_v5  ;;  %1468 = vmatpush3.bf16.msra.mxu1 %v1528_v19 }
  0x12   : > { %1469 = vmatprep.subr.bf16.mxu1 %v1588_v1 }
  0x13   : > { %v461_v7 = vshrl.u32 %v1327_v6, 16  ;;  %v464_v8 = vshll.u32 %v1327_v6, 16  ;;  %v1340_v6 = vld [vmem:[%s1942_s6] ss:$0 sm:$0xff] }
  0x15   : > { %v463_v10 = vrot.slane %v461_v7, 7  ;;  %1470 = vmatpush3.bf16.msra.mxu1 %v1529_v20 }
  0x16   : > { %1471 = vmatprep.subr.bf16.mxu1 %v1588_v1 }
  0x17   : > { %v466_v12 = vor.u32 %v464_v8, %v463_v10 }
  0x19   : > { %v471_v13 = vsel %vm1692_vm4, 0, %v466_v12  ;;  %1472 = vmatpush3.bf16.msra.mxu1 %v1530_v21 }
  0x1a   : > { %v475_v14 = vsel %vm1696_vm5, 0, %v471_v13  ;;  %1473 = vmatprep.subr.bf16.mxu1 %v1588_v1  ;;  %v1544_v13 = vld [vmem:[%s1945_s9 + $0x40] sm:$0xff]  }
  0x1b   : > { %477 = vrot.lane.b32.xlu0 %v475_v14, %s1590_s16  ;;  %v1545_v14 = vld [vmem:[%s1945_s9] sm:$0xff]   ;;  %s1592_s16 = smov 16  }
  0x1d   : > { %1474 = vmatpush3.bf16.msra.mxu1 %v1531_v22  ;;  %v1549_v22 = vld [vmem:[%s1945_s9 + $0x10] sm:$0xff]  }
  0x1e   : > { %1475 = vmatprep.subr.bf16.mxu1 %v1588_v1 }
  0x21   : > { %1476 = vmatpush3.bf16.msra.mxu1 %v1532_v23 }
  0x22   : > { %1477 = vmatprep.subr.bf16.mxu1 %v1588_v1 }
  0x25   : > { %1478 = vmatpush3.bf16.msra.mxu1 %v1533_v24 }
  0x26   : > { %1503 = vmatprep.subr.bf16.mxu1 %v1588_v1 }
  0x8d   : > { %v478_v15 = vpop.permute.xlu0 %477 }
  0x8e   : > { %v482_v16 = vsel %vm479_vm6, %v437_v5, %v478_v15  ;;  %v1543_v5 = vld [vmem:[%s1943_s7 + $0x8] sm:$0xff]  }
  0x8f   : > { %1460 = vmatmul.mubr.msk.bf16.vlgmr.msra.gmra.mrb[0].mxu0 %vm495_vm7, %v482_v16  ;;  %v1547_v16 = vld [vmem:[%s1945_s9 + $0x8] sm:$0xff]  }
  0x90   : > { %1499 = vmatprep.mubr.msk.bf16.mxu0 %vm1589_vm0, %v1588_v1  ;;  %1484 = vmatpush3.bf16.msra.mxu0 %v1534_v41  ;;  %v1564_v41 = vld [vmem:[%s1947_s11 + $0x50] sm:$0xff]  }
  0x91   : > { %1485 = vmatprep.subr.bf16.mxu0 %v1588_v1 }
  0x94   : > { %1486 = vmatpush3.bf16.msra.mxu0 %v1535_v42  ;;  %v1565_v42 = vld [vmem:[%s1947_s11 + $0x10] sm:$0xff]  }
  0x95   : > { %1487 = vmatprep.subr.bf16.mxu0 %v1588_v1 }
  0x98   : > { %1488 = vmatpush3.bf16.msra.mxu0 %v1536_v43  ;;  %v1566_v43 = vld [vmem:[%s1947_s11 + $0x58] sm:$0xff]  }
  0x99   : > { %1489 = vmatprep.subr.bf16.mxu0 %v1588_v1 }
  0x9c   : > { %1490 = vmatpush3.bf16.msra.mxu0 %v1537_v44  ;;  %v1349_v44 = vld [vmem:[%s1944_s8] ss:$0 sm:$0xff] }
  0x9d   : > { %1491 = vmatprep.subr.bf16.mxu0 %v1588_v1 }
  0xa0   : > { %1492 = vmatpush3.bf16.msra.mxu0 %v1538_v45 }
  0xa1   : > { %1493 = vmatprep.subr.bf16.mxu0 %v1588_v1 }
  0xa4   : > { %1494 = vmatpush3.bf16.msra.mxu0 %v1539_v46 }
  0xa5   : > { %1495 = vmatprep.subr.bf16.mxu0 %v1588_v1 }
  0xa8   : > { %1496 = vmatpush3.bf16.msra.mxu0 %v1540_v47 }
  0xa9   : > { %1497 = vmatprep.subr.bf16.mxu0 %v1588_v1 }
  0xac   : > { %1498 = vmatpush3.bf16.msra.mxu0 %v1541_v48 }
  0xad   : > { %1413 = vmatprep.subr.bf16.mxu0 %v1544_v13 }
 0x162   : > { %v532_v26 = vpop.f32.mrb[0].mxu0 }
 0x163   : > { %v533_v27 = vadd.f32 %v1328_v25, %v532_v26  ;;  %v1461_v28 = vpop.f32.mrb[1].mxu0  ;;  %v1551_v26 = vld [vmem:[%s1945_s9 + $0x18] sm:$0xff]  }
 0x164   : > { %v535_v29 = vpop.f32.mrb[2].mxu0 }
 0x165   : > { %v538_v30 = vmax.f32 %v533_v27, 0.0  ;;  %v1462_v31 = vpop.f32.mrb[3].mxu0  ;;  %v1552_v29 = vld [vmem:[%s1945_s9 + $0x60] sm:$0xff]  }
 0x166   : > { %v1554_v31 = vld [vmem:[%s1945_s9 + $0x68] sm:$0xff]  }
 0x167   : > { %v539_v32 = vpack.c.bf16 %v538_v30, %v538_v30  ;;  %v1553_v30 = vld [vmem:[%s1945_s9 + $0x20] sm:$0xff]  }
 0x169   : > { %v558_v33 = vshrl.u32 %v539_v32, 16  ;;  %v561_v35 = vshll.u32 %v539_v32, 16 }
 0x16b   : > { %v560_v34 = vrot.slane %v558_v33, 7  ;;  %v1556_v33 = vld [vmem:[%s1945_s9 + $0x70] sm:$0xff]  }
 0x16d   : > { %v563_v36 = vor.u32 %v561_v35, %v560_v34  ;;  %v1557_v34 = vld [vmem:[%s1945_s9 + $0x30] sm:$0xff]   ;;  %v1558_v35 = vld [vmem:[%s1945_s9 + $0x78] sm:$0xff]  }
 0x16f   : > { %v565_v37 = vsel %vm1692_vm4, 0, %v563_v36  ;;  %v1559_v36 = vld [vmem:[%s1945_s9 + $0x38] sm:$0xff]  }
 0x170   : > { %v566_v38 = vsel %vm1696_vm5, 0, %v565_v37  ;;  %v1560_v37 = vld [vmem:[%s1947_s11 + $0x40] sm:$0xff]  }
 0x171   : > { %568 = vrot.lane.b32.xlu0 %v566_v38, %s1591_s20  ;;  %v1561_v38 = vld [vmem:[%s1947_s11] sm:$0xff]  }
 0x1e3   : > { %v569_v39 = vpop.permute.xlu0 %568 }
 0x1e4   : > { %v572_v40 = vsel %vm570_vm8, %v539_v32, %v569_v39  ;;  %v1555_v32 = vld [vmem:[%s1945_s9 + $0x28] sm:$0xff]  }
 0x1e5   : > { %1480 = vmatmul.mubr.bf16.vlgmr.msra.gmra.mrb[0].mxu1 %v572_v40  ;;  %v1562_v39 = vld [vmem:[%s1947_s11 + $0x48] sm:$0xff]  }
 0x1e6   : > { %1507 = vmatprep.mubr.msk.bf16.mxu1 %vm1589_vm0, %v1588_v1  ;;  %1504 = vmatpush3.bf16.msra.mxu1 %v1542_v3  ;;  %v1563_v40 = vld [vmem:[%s1947_s11 + $0x8] sm:$0xff]   ;;  %v1574_v3 = vld [vmem:[%s1947_s11 + $0x78] sm:$0xff]  }
 0x1e7   : > { %1505 = vmatprep.subr.bf16.mxu1 %v1588_v1  ;;  %v1546_v1 = vld [vmem:[%s1945_s9 + $0x48] sm:$0xff]  }
 0x1ea   : > { %1506 = vmatpush3.bf16.msra.mxu1 %v1543_v5  ;;  %v1575_v5 = vld [vmem:[%s1947_s11 + $0x38] sm:$0xff]  }
 0x1eb   : > { %1435 = vmatprep.subr.bf16.mxu1 %v1560_v37 }
 0x2b8   : > { %v662_v50 = vpop.f32.mrb[0].mxu1 }
 0x2b9   : > { %v663_v51 = vadd.f32 %v1331_v49, %v662_v50  ;;  %v1481_v52 = vpop.f32.mrb[1].mxu1 }
 0x2ba   : > { %v665_v53 = vpop.f32.mrb[2].mxu1 }
 0x2bb   : > { %v668_v54 = vmax.f32 %v663_v51, 0.0  ;;  %v1482_v55 = vpop.f32.mrb[3].mxu1 }
 0x2bd   : > { %v669_v56 = vpack.c.bf16 %v668_v54, %v668_v54 }
 0x2bf   : > { %v688_v57 = vshrl.u32 %v669_v56, 16  ;;  %v691_v59 = vshll.u32 %v669_v56, 16 }
 0x2c1   : > { %v690_v58 = vrot.slane %v688_v57, 7 }
 0x2c3   : > { %v693_v60 = vor.u32 %v691_v59, %v690_v58  ;;  %v1567_v58 = vld [vmem:[%s1947_s11 + $0x18] sm:$0xff]   ;;  %v1568_v59 = vld [vmem:[%s1947_s11 + $0x60] sm:$0xff]  }
 0x2c5   : > { %v695_v61 = vsel %vm1692_vm4, 0, %v693_v60  ;;  %v1569_v60 = vld [vmem:[%s1947_s11 + $0x20] sm:$0xff]  }
 0x2c6   : > { %v696_v62 = vsel %vm1696_vm5, 0, %v695_v61  ;;  %v1570_v61 = vld [vmem:[%s1947_s11 + $0x68] sm:$0xff]  }
 0x2c7   : > { %698 = vrot.lane.b32.xlu1 %v696_v62, %s1591_s20  ;;  %v1571_v62 = vld [vmem:[%s1947_s11 + $0x28] sm:$0xff]  }
 0x339   : > { %v699_v63 = vpop.permute.xlu1 %698 }
 0x33a   : > { %v701_v0 = vsel %vm570_vm8, %v669_v56, %v699_v63  ;;  %v1572_v63 = vld [vmem:[%s1947_s11 + $0x70] sm:$0xff]  }
 0x33b   : > { %1500 = vmatmul.mubr.bf16.vlgmr.msra.gmra.mrb[4].mxu0 %v701_v0  ;;  %v1573_v0 = vld [vmem:[%s1947_s11 + $0x30] sm:$0xff]  }
 0x33c   : > { %1414 = vmatpush3.bf16.msra.mxu0 %v1545_v14 }
 0x33d   : > { %1415 = vmatprep.subr.bf16.mxu0 %v1546_v1 }
 0x340   : > { %1416 = vmatpush3.bf16.msra.mxu0 %v1547_v16 }
 0x341   : > { %1417 = vmatprep.subr.bf16.mxu0 %v1548_v18 }
 0x344   : > { %1418 = vmatpush3.bf16.msra.mxu0 %v1549_v22  ;;  %v1370_v22 = vld [vmem:[%s1948_s12] ss:$0 sm:$0xff] }
 0x345   : > { %1419 = vmatprep.subr.bf16.mxu0 %v1550_v2 }
 0x348   : > { %1420 = vmatpush3.bf16.msra.mxu0 %v1551_v26 }
 0x349   : > { %1421 = vmatprep.subr.bf16.mxu0 %v1552_v29 }
 0x34c   : > { %1422 = vmatpush3.bf16.msra.mxu0 %v1553_v30 }
 0x34d   : > { %1423 = vmatprep.subr.bf16.mxu0 %v1554_v31 }
 0x350   : > { %1424 = vmatpush3.bf16.msra.mxu0 %v1555_v32 }
 0x351   : > { %1425 = vmatprep.subr.bf16.mxu0 %v1556_v33 }
 0x354   : > { %1426 = vmatpush3.bf16.msra.mxu0 %v1557_v34 }
 0x355   : > { %1427 = vmatprep.subr.bf16.mxu0 %v1558_v35 }
 0x358   : > { %1428 = vmatpush3.bf16.msra.mxu0 %v1559_v36 }
 0x40e   : > { %v791_v7 = vpop.f32.mrb[4].mxu0 }
 0x40f   : > { %v792_v8 = vadd.f32 %v1340_v6, %v791_v7  ;;  %v1501_v9 = vpop.f32.mrb[5].mxu0  ;;  %v1353_v7 = vld [vmem:[%s1946_s10] ss:$0 sm:$0xff] }
 0x410   : > { %v794_v10 = vpop.f32.mrb[6].mxu0 }
 0x411   : > { %v797_v11 = vmax.f32 %v792_v8, 0.0  ;;  %v1502_v12 = vpop.f32.mrb[7].mxu0 }
 0x413   : > { %v798_v15 = vpack.c.bf16 %v797_v11, %v797_v11 }
 0x415   : > { %v807_v17 = vshll.u32 %v798_v15, 16  ;;  %v805_v19 = vshrl.u32 %v798_v15, 16 }
 0x417   : > { %v809_v20 = vrot.slane %v807_v17, 1 }
 0x419   : > { %v810_v23 = vor.u32 %v809_v20, %v805_v19 }
 0x41b   : > { %v815_v4 = vsel %vm1817_vm12, %v810_v23, 0 }
 0x41c   : > { %v819_v25 = vsel %vm1824_vm13, 0, %v815_v4 }
 0x41d   : > { %821 = vrot.lane.b32.xlu1 %v819_v25, %s1592_s16 }
 0x48f   : > { %v822_v27 = vpop.permute.xlu1 %821 }
 0x490   : > { %v824_v28 = vsel %vm495_vm7, %v798_v15, %v822_v27 }
 0x491   : > { %1508 = vmatmul.mubr.msk.bf16.vlgmr.msra.gmra.mrb[4].mxu1 %vm843_vm14, %v824_v28 }
 0x492   : > { %1436 = vmatpush3.bf16.msra.mxu1 %v1561_v38 }
 0x493   : > { %1437 = vmatprep.subr.bf16.mxu1 %v1562_v39 }
 0x496   : > { %1438 = vmatpush3.bf16.msra.mxu1 %v1563_v40 }
 0x497   : > { %1439 = vmatprep.subr.bf16.mxu1 %v1564_v41 }
 0x49a   : > { %1440 = vmatpush3.bf16.msra.mxu1 %v1565_v42 }
 0x49b   : > { %1441 = vmatprep.subr.bf16.mxu1 %v1566_v43 }
 0x49e   : > { %1442 = vmatpush3.bf16.msra.mxu1 %v1567_v58 }
 0x49f   : > { %1443 = vmatprep.subr.bf16.mxu1 %v1568_v59 }
 0x4a2   : > { %1444 = vmatpush3.bf16.msra.mxu1 %v1569_v60 }
 0x4a3   : > { %1445 = vmatprep.subr.bf16.mxu1 %v1570_v61 }
 0x4a6   : > { %1446 = vmatpush3.bf16.msra.mxu1 %v1571_v62 }
 0x4a7   : > { %1447 = vmatprep.subr.bf16.mxu1 %v1572_v63 }
 0x4aa   : > { %1448 = vmatpush3.bf16.msra.mxu1 %v1573_v0 }
 0x4ab   : > { %1449 = vmatprep.subr.bf16.mxu1 %v1574_v3 }
 0x4ae   : > { %1450 = vmatpush3.bf16.msra.mxu1 %v1575_v5 }
 0x564   : > { %v880_v45 = vpop.f32.mrb[4].mxu1 }
 0x565   : > { %v881_v46 = vadd.f32 %v1349_v44, %v880_v45  ;;  %v1509_v47 = vpop.f32.mrb[5].mxu1 }
 0x566   : > { %v883_v48 = vpop.f32.mrb[6].mxu1 }
 0x567   : > { %v886_v49 = vmax.f32 %v881_v46, 0.0  ;;  %v1510_v50 = vpop.f32.mrb[7].mxu1 }
 0x569   : > { %v887_v51 = vpack.c.bf16 %v886_v49, %v886_v49 }
 0x56b   : > { %v924_v52 = vshll.u32 %v887_v51, 16  ;;  %v922_v53 = vshrl.u32 %v887_v51, 16 }
 0x56d   : > { %v926_v54 = vrot.slane %v924_v52, 1 }
 0x56f   : > { %v927_v55 = vor.u32 %v926_v54, %v922_v53 }
 0x571   : > { %v929_v56 = vsel %vm1817_vm12, %v927_v55, 0 }
 0x572   : > { %v930_v57 = vsel %vm1824_vm13, 0, %v929_v56 }
 0x573   : > { %1065 = vmatprep.mubr.bf16.mxu0 %v930_v57 }
 0x574   : > { %1066 = vmatmul.mubr.bf16.vlgmr.msra.gmra.mrb[8].mxu0 %v887_v51 }
 0x647   : > { %v1429_v6 = vpop.f32.mrb[8].mxu0 }
 0x648   : > { %v1430_v8 = vpop.f32.mrb[9].mxu0 }
 0x649   : > { %v1431_v9 = vadd.f32 %v1430_v8, %v1429_v6  ;;  %v1432_v10 = vpop.f32.mrb[10].mxu0 }
 0x64a   : > { %v1433_v11 = vpop.f32.mrb[11].mxu0 }
 0x64b   : > { %v1068_v12 = vadd.f32 %v1431_v9, %v1353_v7 }
 0x64d   : > { %v1073_v13 = vmax.f32 %v1068_v12, 0.0 }
 0x64f   : > { %v1074_v14 = vpack.c.bf16 %v1073_v13, %v1073_v13 }
 0x651   : > { %v1111_v1 = vshll.u32 %v1074_v14, 16  ;;  %v1109_v15 = vshrl.u32 %v1074_v14, 16 }
 0x653   : > { %v1113_v16 = vrot.slane %v1111_v1, 1 }
 0x655   : > { %v1114_v17 = vor.u32 %v1113_v16, %v1109_v15 }
 0x657   : > { %v1116_v18 = vsel %vm1817_vm12, %v1114_v17, 0 }
 0x658   : > { %v1117_v19 = vsel %vm1824_vm13, 0, %v1116_v18 }
 0x659   : > { %1252 = vmatprep.mubr.bf16.mxu1 %v1117_v19 }
 0x65a   : > { %1253 = vmatmul.mubr.bf16.vlgmr.msra.gmra.mrb[8].mxu1 %v1074_v14 }
 0x72d   : > { %v1451_v20 = vpop.f32.mrb[8].mxu1 }
 0x72e   : > { %v1452_v23 = vpop.f32.mrb[9].mxu1 }
 0x72f   : > { %v1453_v2 = vadd.f32 %v1452_v23, %v1451_v20  ;;  %v1454_v4 = vpop.f32.mrb[10].mxu1 }
 0x730   : > { %v1455_v25 = vpop.f32.mrb[11].mxu1 }
 0x731   : > { %v1255_v26 = vadd.f32 %v1453_v2, %v1370_v22 }
 0x733   : > { %v1387_v27 = vmul.f32 -1.442695, %v1255_v26 }
 0x735   : > { %1576 = vpow2.f32 %v1387_v27 }
 0x73f   : > { %v1577_v21 = vpop.eup %1576 }
 0x740   : > { %v1263_v28 = vadd.f32 1.0, %v1577_v21 }
 0x742   : > { %1578 = vrcp.f32 %v1263_v28 }
 0x74c   : > { %v1579_v24 = vpop.eup %1578 }
 0x74d   : > { %1266 = vst.msk [vmem:[%s435_s15] sm:$0xff] %vm570_vm8, %v1579_v24 }
 0x74e PF: > { %s23_s25 = sadd.s32 1, %s1586_s25  }
 0x74f   : > { %p20_p4 = scmp.ge.s32.totalorder %s23_s25, 4  }
 0x751   :  { %22 = sbr.rel (!%p20_p4) target bundleno = 1 (0x1), region = 102 }

</bundles_post_ra>
